<compile_context>
chip_gen: v7x
topology: tpu7x:2x2x1
jax: 0.10.0
libtpu: 0.0.40
codegen_flags: <defaults>
</compile_context>

<pallas_src>
import functools

import numpy as np
import jax
import jax.numpy as jnp
from jax.experimental import pallas as pl
from jax.experimental.pallas import tpu as pltpu


def _round_up(a, b):
    return (a + b - 1) // b * b


# ---------------------------------------------------------------------------
# Parameter init (PyTorch layout: W as [in, out], b as [1, out])
# ---------------------------------------------------------------------------
def init_params(key, num_channels):
    C = num_channels
    shapes = {
        # embedding_net
        "e_w0": (C + 1, C), "e_b0": (1, C),
        "e_w1": (C, C),     "e_b1": (1, C),
        "e_w2": (C, C),     "e_b2": (1, C),
        # reward_net
        "r_w0": (C, C),     "r_b0": (1, C),
        "r_w1": (C, 1),     "r_b1": (1, 1),
        # done_net
        "d_w0": (C, C),     "d_b0": (1, C),
        "d_w1": (C, 1),     "d_b1": (1, 1),
        # dynamics_net
        "y_w0": (C + 1, C), "y_b0": (1, C),
        "y_w1": (C, C),     "y_b1": (1, C),
        "y_w2": (C, C),     "y_b2": (1, C),
    }
    params = {}
    keys = jax.random.split(key, len(shapes))
    for k, (name, shape) in zip(keys, sorted(shapes.items())):
        fan_in = shape[0] if "w" in name else shape[1]
        scale = 1.0 / jnp.sqrt(jnp.float32(fan_in))
        params[name] = scale * jax.random.normal(k, shape, jnp.float32)
    return params


# ---------------------------------------------------------------------------
# Packed-slab layout
# ---------------------------------------------------------------------------
def _layout(num_channels):
    C = num_channels
    padc = _round_up(C, 128)          # padded feature width per branch
    pad_in = _round_up(C + 1, 128)    # padded input feature width
    w = 2 * padc                      # fused (branch-y | branch-e) width
    o_w0 = 0                          # [pad_in, w]  fused x -> (dyn0 | emb0)
    o_w1 = o_w0 + pad_in              # [w, w]       block-diag (dyn1 | emb1)
    o_w2 = o_w1 + w                   # [w, w]       block-diag (dyn2 | emb2)
    o_wrd = o_w2 + w                  # [padc, w]    fused emb -> (rew0 | done0)
    o_wh = o_wrd + padc               # [w, padc]    fused heads (col0=rew, col1=done)
    o_b = o_wh + w                    # [8, w]       biases (rows 0..4 used)
    rows = o_b + 8
    return dict(C=C, padc=padc, pad_in=pad_in, w=w, o_w0=o_w0, o_w1=o_w1,
                o_w2=o_w2, o_wrd=o_wrd, o_wh=o_wh, o_b=o_b, rows=rows)


def pack_params(params, num_channels):
    """Pack every weight/bias into one zero-padded f32 slab [rows, 2*padc]."""
    L = _layout(num_channels)
    C, padc, w = L["C"], L["padc"], L["w"]
    slab = np.zeros((L["rows"], w), np.float32)

    def put(arr, r0, c0):
        a = np.asarray(arr, np.float32)
        slab[r0:r0 + a.shape[0], c0:c0 + a.shape[1]] = a

    # fused first layer: x feeds both dynamics_net[0] and embedding_net[0]
    put(params["y_w0"], L["o_w0"], 0)
    put(params["e_w0"], L["o_w0"], padc)
    # block-diagonal middle layers (y-branch in lanes 0:padc, e-branch in padc:2padc)
    put(params["y_w1"], L["o_w1"], 0)
    put(params["e_w1"], L["o_w1"] + padc, padc)
    put(params["y_w2"], L["o_w2"], 0)
    put(params["e_w2"], L["o_w2"] + padc, padc)
    # fused reward/done hidden layer (both read the embedding)
    put(params["r_w0"], L["o_wrd"], 0)
    put(params["d_w0"], L["o_wrd"], padc)
    # fused 1-wide heads: col 0 = reward, col 1 = done logit
    put(params["r_w1"], L["o_wh"], 0)
    put(params["d_w1"], L["o_wh"] + padc, 1)
    # biases
    put(params["y_b0"], L["o_b"] + 0, 0)
    put(params["e_b0"], L["o_b"] + 0, padc)
    put(params["y_b1"], L["o_b"] + 1, 0)
    put(params["e_b1"], L["o_b"] + 1, padc)
    put(params["y_b2"], L["o_b"] + 2, 0)
    put(params["e_b2"], L["o_b"] + 2, padc)
    put(params["r_b0"], L["o_b"] + 3, 0)
    put(params["d_b0"], L["o_b"] + 3, padc)
    put(params["r_b1"], L["o_b"] + 4, 0)
    put(params["d_b1"], L["o_b"] + 4, 1)
    return jnp.asarray(slab)


# ---------------------------------------------------------------------------
# Forward pass
# ---------------------------------------------------------------------------
@functools.partial(jax.jit, static_argnames=("num_channels",))
def dynamics_forward(x, slab, num_channels):
    L = _layout(num_channels)
    C, padc, pad_in, w = L["C"], L["padc"], L["pad_in"], L["w"]
    o_w0, o_w1, o_w2 = L["o_w0"], L["o_w1"], L["o_w2"]
    o_wrd, o_wh, o_b = L["o_wrd"], L["o_wh"], L["o_b"]

    B = x.shape[0]
    tb = min(256, _round_up(B, 8))        # batch tile (rows per grid step)
    b_pad = _round_up(B, tb)

    # explicit zero-pad of batch + feature (contraction) dims
    x_p = jnp.zeros((b_pad, pad_in), jnp.float32)
    x_p = x_p.at[:B, : C + 1].set(x.astype(jnp.float32))

    def kernel(x_ref, w_ref, o_ref):
        xb = x_ref[...]                                       # [tb, pad_in]

        def lin(h, row0, nrows, ncols, bias_row):
            wblk = w_ref[row0:row0 + nrows, 0:ncols]
            bias = w_ref[o_b + bias_row:o_b + bias_row + 1, 0:ncols]
            return jnp.dot(h, wblk, preferred_element_type=jnp.float32) + bias

        # fused (dynamics | embedding) trunk: 3 matmuls total for 6 Linears
        he = jnp.maximum(lin(xb, o_w0, pad_in, w, 0), 0.0)
        he = jnp.maximum(lin(he, o_w1, w, w, 1), 0.0)
        he = lin(he, o_w2, w, w, 2)                           # no ReLU
        o_ref[:, 0:padc] = he[:, 0:padc]                      # next latent (lane-padded)

        emb = he[:, padc:w]                                   # embedding branch
        # fused (reward | done) hidden layer + fused 1-wide heads
        rd = jnp.maximum(lin(emb, o_wrd, padc, w, 3), 0.0)
        heads = lin(rd, o_wh, w, padc, 4)                     # col0=reward, col1=done logit
        lane = jax.lax.broadcasted_iota(jnp.int32, heads.shape, 1)
        heads = jnp.where(lane == 1, jax.nn.sigmoid(heads), heads)
        o_ref[:, padc:w] = heads                              # lane-dense store

    out = pl.pallas_call(
        kernel,
        out_shape=jax.ShapeDtypeStruct((b_pad, w), jnp.float32),
        grid=(b_pad // tb,),
        in_specs=[
            pl.BlockSpec((tb, pad_in), lambda i: (i, 0)),
            # constant index_map -> slab DMA'd once, stays resident in VMEM
            pl.BlockSpec((L["rows"], w), lambda i: (0, 0)),
        ],
        out_specs=pl.BlockSpec((tb, w), lambda i: (i, 0)),
        compiler_params=pltpu.CompilerParams(
            dimension_semantics=("parallel",),
            vmem_limit_bytes=32 * 1024 * 1024,
        ),
    )(x_p, slab)

    next_latent = out[:B, 0:C]
    reward = out[:B, padc]          # Flatten(0) of the [B, 1] reward head
    done = out[:B, padc + 1]        # sigmoid already applied in-kernel
    return next_latent, reward, done


# ---------------------------------------------------------------------------
# Pure-JAX reference
# ---------------------------------------------------------------------------
def _reference_forward(x, params):
    def lin(h, w, b):
        return h @ w + b

    h = jnp.maximum(lin(x, params["y_w0"], params["y_b0"]), 0.0)
    h = jnp.maximum(lin(h, params["y_w1"], params["y_b1"]), 0.0)
    nxt = lin(h, params["y_w2"], params["y_b2"])

    e = jnp.maximum(lin(x, params["e_w0"], params["e_b0"]), 0.0)
    e = jnp.maximum(lin(e, params["e_w1"], params["e_b1"]), 0.0)
    e = lin(e, params["e_w2"], params["e_b2"])

    r = jnp.maximum(lin(e, params["r_w0"], params["r_b0"]), 0.0)
    rew = lin(r, params["r_w1"], params["r_b1"]).reshape(-1)

    d = jnp.maximum(lin(e, params["d_w0"], params["d_b0"]), 0.0)
    dn = jax.nn.sigmoid(lin(d, params["d_w1"], params["d_b1"])).reshape(-1)
    return nxt, rew, dn


if __name__ == "__main__":
    num_channels = 32   # C
    batch = 8           # B

    key = jax.random.PRNGKey(0)
    k_params, k_x = jax.random.split(key)
    params = init_params(k_params, num_channels)
    slab = pack_params(params, num_channels)
    x = jax.random.normal(k_x, (batch, num_channels + 1), jnp.float32)

    next_latent, reward, done = dynamics_forward(x, slab, num_channels)
    jax.block_until_ready((next_latent, reward, done))

    ref_next, ref_rew, ref_done = _reference_forward(x, params)
    assert next_latent.shape == (batch, num_channels)
    assert reward.shape == (batch,)
    assert done.shape == (batch,)
    assert jnp.allclose(next_latent, ref_next, atol=1e-4, rtol=1e-4)
    assert jnp.allclose(reward, ref_rew, atol=1e-4, rtol=1e-4)
    assert jnp.allclose(done, ref_done, atol=1e-4, rtol=1e-4)

    print("KERNEL_OK")
</pallas_src>

<mosaic_0001>
module attributes {stable_mosaic.version = 11 : i64} {
  func.func @kernel(%arg0: i32, %arg1: memref<8x128xf32, #tpu.memory_space<vmem>>, %arg2: memref<1032x256xf32, #tpu.memory_space<vmem>>, %arg3: memref<8x256xf32, #tpu.memory_space<vmem>>) attributes {dimension_semantics = [#tpu.dimension_semantics<parallel>], iteration_bounds = array<i64: 1>, scalar_prefetch = 0 : i64, scratch_operands = 0 : i64, tpu.core_type = #tpu.core_type<tc>, window_params = [{transform_indices = @transform_0, window_bounds = array<i64: 8, 128>}, {pipeline_mode = #tpu.pipeline_mode<synchronous>, transform_indices = @transform_1, window_bounds = array<i64: 1032, 256>}, {transform_indices = @transform_2, window_bounds = array<i64: 8, 256>}]} {
    %c0 = arith.constant 0 : index
    %c0_0 = arith.constant 0 : index
    %0 = vector.load %arg1[%c0, %c0_0] : memref<8x128xf32, #tpu.memory_space<vmem>>, vector<8x128xf32>
    %c0_1 = arith.constant 0 : index
    %c0_2 = arith.constant 0 : index
    %1 = vector.load %arg2[%c0_1, %c0_2] : memref<1032x256xf32, #tpu.memory_space<vmem>>, vector<128x256xf32>
    %c1024 = arith.constant 1024 : index
    %c0_3 = arith.constant 0 : index
    %2 = vector.load %arg2[%c1024, %c0_3] : memref<1032x256xf32, #tpu.memory_space<vmem>>, vector<1x256xf32>
    %cst = arith.constant dense<0.000000e+00> : vector<8x256xf32>
    %3 = tpu.matmul %0, %1, %cst {dimension_numbers = #tpu.dot_dimension_numbers<[1], [0], [0], [1], [0, 0, 1, 1], [], []>} : vector<8x128xf32>, vector<128x256xf32>, vector<8x256xf32> -> vector<8x256xf32>
    %4 = vector.broadcast %2 : vector<1x256xf32> to vector<8x256xf32>
    %5 = arith.addf %3, %4 : vector<8x256xf32>
    %cst_4 = arith.constant 0.000000e+00 : f32
    %6 = vector.broadcast %cst_4 : f32 to vector<8x256xf32>
    %7 = arith.maximumf %5, %6 : vector<8x256xf32>
    %c128 = arith.constant 128 : index
    %c0_5 = arith.constant 0 : index
    %8 = vector.load %arg2[%c128, %c0_5] : memref<1032x256xf32, #tpu.memory_space<vmem>>, vector<256x256xf32>
    %c1025 = arith.constant 1025 : index
    %c0_6 = arith.constant 0 : index
    %9 = vector.load %arg2[%c1025, %c0_6] : memref<1032x256xf32, #tpu.memory_space<vmem>>, vector<1x256xf32>
    %cst_7 = arith.constant dense<0.000000e+00> : vector<8x256xf32>
    %10 = tpu.matmul %7, %8, %cst_7 {dimension_numbers = #tpu.dot_dimension_numbers<[1], [0], [0], [1], [0, 0, 1, 1], [], []>} : vector<8x256xf32>, vector<256x256xf32>, vector<8x256xf32> -> vector<8x256xf32>
    %11 = vector.broadcast %9 : vector<1x256xf32> to vector<8x256xf32>
    %12 = arith.addf %10, %11 : vector<8x256xf32>
    %cst_8 = arith.constant 0.000000e+00 : f32
    %13 = vector.broadcast %cst_8 : f32 to vector<8x256xf32>
    %14 = arith.maximumf %12, %13 : vector<8x256xf32>
    %c384 = arith.constant 384 : index
    %c0_9 = arith.constant 0 : index
    %15 = vector.load %arg2[%c384, %c0_9] : memref<1032x256xf32, #tpu.memory_space<vmem>>, vector<256x256xf32>
    %c1026 = arith.constant 1026 : index
    %c0_10 = arith.constant 0 : index
    %16 = vector.load %arg2[%c1026, %c0_10] : memref<1032x256xf32, #tpu.memory_space<vmem>>, vector<1x256xf32>
    %cst_11 = arith.constant dense<0.000000e+00> : vector<8x256xf32>
    %17 = tpu.matmul %14, %15, %cst_11 {dimension_numbers = #tpu.dot_dimension_numbers<[1], [0], [0], [1], [0, 0, 1, 1], [], []>} : vector<8x256xf32>, vector<256x256xf32>, vector<8x256xf32> -> vector<8x256xf32>
    %18 = vector.broadcast %16 : vector<1x256xf32> to vector<8x256xf32>
    %19 = arith.addf %17, %18 : vector<8x256xf32>
    %20 = vector.extract_strided_slice %19 {offsets = [0, 0], sizes = [8, 128], strides = [1, 1]} : vector<8x256xf32> to vector<8x128xf32>
    %c0_12 = arith.constant 0 : index
    %c0_13 = arith.constant 0 : index
    %21 = vector.load %arg3[%c0_12, %c0_13] : memref<8x256xf32, #tpu.memory_space<vmem>>, vector<8x128xf32>
    tpu.vector_store %arg3[%c0_12, %c0_13], %20 {strides = array<i32>} : memref<8x256xf32, #tpu.memory_space<vmem>>, vector<8x128xf32>,
    %22 = vector.extract_strided_slice %19 {offsets = [0, 128], sizes = [8, 128], strides = [1, 1]} : vector<8x256xf32> to vector<8x128xf32>
    %c640 = arith.constant 640 : index
    %c0_14 = arith.constant 0 : index
    %23 = vector.load %arg2[%c640, %c0_14] : memref<1032x256xf32, #tpu.memory_space<vmem>>, vector<128x256xf32>
    %c1027 = arith.constant 1027 : index
    %c0_15 = arith.constant 0 : index
    %24 = vector.load %arg2[%c1027, %c0_15] : memref<1032x256xf32, #tpu.memory_space<vmem>>, vector<1x256xf32>
    %cst_16 = arith.constant dense<0.000000e+00> : vector<8x256xf32>
    %25 = tpu.matmul %22, %23, %cst_16 {dimension_numbers = #tpu.dot_dimension_numbers<[1], [0], [0], [1], [0, 0, 1, 1], [], []>} : vector<8x128xf32>, vector<128x256xf32>, vector<8x256xf32> -> vector<8x256xf32>
    %26 = vector.broadcast %24 : vector<1x256xf32> to vector<8x256xf32>
    %27 = arith.addf %25, %26 : vector<8x256xf32>
    %cst_17 = arith.constant 0.000000e+00 : f32
    %28 = vector.broadcast %cst_17 : f32 to vector<8x256xf32>
    %29 = arith.maximumf %27, %28 : vector<8x256xf32>
    %c768 = arith.constant 768 : index
    %c0_18 = arith.constant 0 : index
    %30 = vector.load %arg2[%c768, %c0_18] : memref<1032x256xf32, #tpu.memory_space<vmem>>, vector<256x128xf32>
    %c1028 = arith.constant 1028 : index
    %c0_19 = arith.constant 0 : index
    %31 = vector.load %arg2[%c1028, %c0_19] : memref<1032x256xf32, #tpu.memory_space<vmem>>, vector<1x128xf32>
    %cst_20 = arith.constant dense<0.000000e+00> : vector<8x128xf32>
    %32 = tpu.matmul %29, %30, %cst_20 {dimension_numbers = #tpu.dot_dimension_numbers<[1], [0], [0], [1], [0, 0, 1, 1], [], []>} : vector<8x256xf32>, vector<256x128xf32>, vector<8x128xf32> -> vector<8x128xf32>
    %33 = vector.broadcast %31 : vector<1x128xf32> to vector<8x128xf32>
    %34 = arith.addf %32, %33 : vector<8x128xf32>
    %35 = tpu.iota {dimensions = array<i32: 1>} : vector<8x128xi32>
    %c1_i32 = arith.constant 1 : i32
    %36 = vector.broadcast %c1_i32 : i32 to vector<8x128xi32>
    %37 = arith.cmpi eq, %35, %36 : vector<8x128xi32>
    %38 = arith.negf %34 : vector<8x128xf32>
    %39 = math.exp %38 : vector<8x128xf32>
    %cst_21 = arith.constant 1.000000e+00 : f32
    %40 = vector.broadcast %cst_21 : f32 to vector<8x128xf32>
    %41 = arith.addf %40, %39 : vector<8x128xf32>
    %42 = arith.divf %40, %41 : vector<8x128xf32>
    %43 = arith.select %37, %42, %34 : vector<8x128xi1>, vector<8x128xf32>
    %c0_22 = arith.constant 0 : index
    %c128_23 = arith.constant 128 : index
    %44 = vector.load %arg3[%c0_22, %c128_23] : memref<8x256xf32, #tpu.memory_space<vmem>>, vector<8x128xf32>
    tpu.vector_store %arg3[%c0_22, %c128_23], %43 {strides = array<i32>} : memref<8x256xf32, #tpu.memory_space<vmem>>, vector<8x128xf32>,
    return
  }
  func.func @transform_0(%arg0: i32) -> (i32, i32) {
    %c0_i32 = arith.constant 0 : i32
    %c0_i32_0 = arith.constant 0 : i32
    return %arg0, %c0_i32 : i32, i32
  }
  func.func @transform_1(%arg0: i32) -> (i32, i32) {
    %c0_i32 = arith.constant 0 : i32
    %c0_i32_0 = arith.constant 0 : i32
    %c0_i32_1 = arith.constant 0 : i32
    return %c0_i32, %c0_i32_0 : i32, i32
  }
  func.func @transform_2(%arg0: i32) -> (i32, i32) {
    %c0_i32 = arith.constant 0 : i32
    %c0_i32_0 = arith.constant 0 : i32
    return %arg0, %c0_i32 : i32, i32
  }
}

</mosaic_0001>

<bundles_post_ra>
// kernel: dynamics_forward.1
= control target key start
LH: loop header
LB: loop body
LE: loop exit
PB: predicated region body
PF: predicated region fallthrough
CT: control target
= control target key end

     0   :  { %7 = vsyncpa [#allocation3], 0  ;;  %s972_s9 = smov [#allocation2]   ;;  %s1028_s0 = inlined_call_operand.vmem [shape: f32[8,128], index: 0, kind: input, shape index: {}]   ;;  %s1029_s1 = inlined_call_operand.hbm [shape: f32[1032,256], index: 1, kind: input, shape index: {}]   ;;  %s1030_s2 = inlined_call_operand.vmem [shape: f32[8,256], index: 2, kind: output, shape index: {}]  }
   0x1   :  { %s15_s10 = sshll.u32 %s972_s9, 4  ;;  %s948_s13 = scalar_lea.hbm %s1029_s1, 33024  ;;  %s16_s10 = int_to_ptr.vmem [resolvable:$true] %s15_s10 }
   0x2   :  { %p949_p0 = scmp.ne.s32.totalorder %s1029_s1, %s948_s13  ;;  %p952_p1 = scmp.lt.u32.totalorder %s948_s13, %s1029_s1 }
   0x4   :  { %p954_p2 = pnand %p952_p1, %p949_p0 }
   0x6   :  { %957 = shalt.err (!%p954_p2)
}
   0x7   :  { %s958_s18 = scalar_lea.vmem %s16_s10, 33024  ;;  %p963_p4 = scmp.lt.s32.totalorder %s16_s10, %s16_s10 }
   0x8   :  { %p959_p3 = scmp.ne.s32.totalorder %s16_s10, %s958_s18  ;;  %p964_p5 = scmp.lt.s32.totalorder %s958_s18, %s958_s18 }
   0xa   :  { %p965_p6 = por %p964_p5, %p963_p4 }
   0xc   :  { %p966_p7 = pnand %p965_p6, %p959_p3 }
   0xe   :  { %969 = shalt.err (!%p966_p7)
}
   0xf   :  { %s973_s19 = smov 256   ;;  %s974_s20 = smov 16  }
  0x10   :  { %21 = dma.hbm_to_vmem [thread:$0]  %s1029_s1, 33024, %s16_s10, [#allocation3], %s973_s19, %s973_s19, %s974_s20  }
  0x11   :  { %970 = dma.done.wait [#allocation3], 33024  }
  0x12   :  { %971 = vsyncadd [#allocation3], 4294934272  ;;  %v975_v0 = vmov 0.0   ;;  %v27_v1 = vld [vmem:[#allocation2 + $0x8] sm:$0xff]  ;;  %v29_v2 = vld [vmem:[#allocation2 + $0x18] sm:$0xff] }
  0x13   :  { %135 = vmatprep.mubr.f32.mxu0 %v975_v0  ;;  %v26_v3 = vld [vmem:[#allocation2] sm:$0xff]  ;;  %v716_v4 = vpack.c.bf16 %v29_v2, %v27_v1  ;;  %v28_v5 = vld [vmem:[#allocation2 + $0x10] sm:$0xff]  ;;  %v31_v6 = vld [vmem:[#allocation2 + $0x28] sm:$0xff] }
  0x14   :  { %v33_v7 = vld [vmem:[#allocation2 + $0x38] sm:$0xff]  ;;  %v718_v8 = vpack.c.bf16 %v28_v5, %v26_v3  ;;  %v30_v10 = vld [vmem:[#allocation2 + $0x20] sm:$0xff]  ;;  %v32_v11 = vld [vmem:[#allocation2 + $0x30] sm:$0xff] }
  0x15   :  { %v720_v9 = vpack.c.bf16 %v33_v7, %v31_v6  ;;  %v35_v12 = vld [vmem:[#allocation2 + $0x48] sm:$0xff]  ;;  %717 = vmatprep.subr.bf16.mxu0 %v716_v4  ;;  %v37_v13 = vld [vmem:[#allocation2 + $0x58] sm:$0xff]  ;;  %v722_v14 = vpack.c.bf16 %v32_v11, %v30_v10  ;;  %v34_v16 = vld [vmem:[#allocation2 + $0x40] sm:$0xff] }
  0x16   :  { %719 = vmatpush1.bf16.msra.mxu0 %v718_v8  ;;  %v724_v15 = vpack.c.bf16 %v37_v13, %v35_v12  ;;  %v36_v17 = vld [vmem:[#allocation2 + $0x50] sm:$0xff]  ;;  %v39_v18 = vld [vmem:[#allocation2 + $0x68] sm:$0xff]  ;;  %v41_v19 = vld [vmem:[#allocation2 + $0x78] sm:$0xff] }
  0x17   :  { %721 = vmatprep.subr.bf16.mxu0 %v720_v9  ;;  %v726_v20 = vpack.c.bf16 %v36_v17, %v34_v16  ;;  %v728_v21 = vpack.c.bf16 %v41_v19, %v39_v18  ;;  %v38_v22 = vld [vmem:[#allocation2 + $0x60] sm:$0xff]  ;;  %v40_v23 = vld [vmem:[#allocation2 + $0x70] sm:$0xff]  ;;  %v43_v24 = vld [vmem:[#allocation2 + $0x88] sm:$0xff] }
  0x18   :  { %v45_v25 = vld [vmem:[#allocation2 + $0x98] sm:$0xff]  ;;  %v42_v26 = vld [vmem:[#allocation2 + $0x80] sm:$0xff]  ;;  %v44_v27 = vld [vmem:[#allocation2 + $0x90] sm:$0xff]  ;;  %v730_v31 = vpack.c.bf16 %v40_v23, %v38_v22 }
  0x19   :  { %v145_v28 = vld [vmem:[#allocation2 + $0x108] sm:$0xff]  ;;  %v147_v29 = vld [vmem:[#allocation2 + $0x118] sm:$0xff]  ;;  %v144_v30 = vld [vmem:[#allocation2 + $0x100] sm:$0xff]  ;;  %v732_v36 = vpack.c.bf16 %v45_v25, %v43_v24  ;;  %v734_v46 = vpack.c.bf16 %v44_v27, %v42_v26 }
  0x1a   :  { %723 = vmatpush1.bf16.msra.mxu0 %v722_v14  ;;  %v748_v32 = vpack.c.bf16 %v147_v29, %v145_v28  ;;  %v146_v33 = vld [vmem:[#allocation2 + $0x110] sm:$0xff]  ;;  %v149_v34 = vld [vmem:[#allocation2 + $0x128] sm:$0xff]  ;;  %v151_v35 = vld [vmem:[#allocation2 + $0x138] sm:$0xff] }
  0x1b   :  { %725 = vmatprep.subr.bf16.mxu0 %v724_v15  ;;  %v750_v37 = vpack.c.bf16 %v146_v33, %v144_v30  ;;  %v752_v38 = vpack.c.bf16 %v151_v35, %v149_v34  ;;  %v148_v39 = vld [vmem:[#allocation2 + $0x120] sm:$0xff]  ;;  %v150_v40 = vld [vmem:[#allocation2 + $0x130] sm:$0xff]  ;;  %v153_v41 = vld [vmem:[#allocation2 + $0x148] sm:$0xff] }
  0x1c   :  { %v47_v42 = vld [vmem:[#allocation2 + $0xa8] sm:$0xff]  ;;  %v49_v43 = vld [vmem:[#allocation2 + $0xb8] sm:$0xff]  ;;  %749 = vmatprep.subr.bf16.mxu1 %v748_v32  ;;  %v754_v45 = vpack.c.bf16 %v150_v40, %v148_v39  ;;  %v46_v47 = vld [vmem:[#allocation2 + $0xa0] sm:$0xff] }
  0x1d   :  { %v155_v44 = vld [vmem:[#allocation2 + $0x158] sm:$0xff]  ;;  %751 = vmatpush1.bf16.msra.mxu1 %v750_v37  ;;  %v152_v49 = vld [vmem:[#allocation2 + $0x140] sm:$0xff]  ;;  %v154_v50 = vld [vmem:[#allocation2 + $0x150] sm:$0xff]  ;;  %v736_v51 = vpack.c.bf16 %v49_v43, %v47_v42 }
  0x1e   :  { %727 = vmatpush1.bf16.msra.mxu0 %v726_v20  ;;  %753 = vmatprep.subr.bf16.mxu1 %v752_v38  ;;  %v756_v48 = vpack.c.bf16 %v155_v44, %v153_v41  ;;  %v48_v52 = vld [vmem:[#allocation2 + $0xb0] sm:$0xff]  ;;  %v157_v53 = vld [vmem:[#allocation2 + $0x168] sm:$0xff]  ;;  %v159_v54 = vld [vmem:[#allocation2 + $0x178] sm:$0xff]  ;;  %v758_v57 = vpack.c.bf16 %v154_v50, %v152_v49 }
  0x1f   :  { %729 = vmatprep.subr.bf16.mxu0 %v728_v21  ;;  %v51_v55 = vld [vmem:[#allocation2 + $0xc8] sm:$0xff]  ;;  %v53_v56 = vld [vmem:[#allocation2 + $0xd8] sm:$0xff]  ;;  %v738_v58 = vpack.c.bf16 %v48_v52, %v46_v47  ;;  %v50_v59 = vld [vmem:[#allocation2 + $0xc0] sm:$0xff]  ;;  %v760_v60 = vpack.c.bf16 %v159_v54, %v157_v53 }
  0x20   :  { %v156_v61 = vld [vmem:[#allocation2 + $0x160] sm:$0xff]  ;;  %v158_v62 = vld [vmem:[#allocation2 + $0x170] sm:$0xff]  ;;  %v740_v63 = vpack.c.bf16 %v53_v56, %v51_v55  ;;  %v161_v2 = vld [vmem:[#allocation2 + $0x188] sm:$0xff] }
  0x21   :  { %755 = vmatpush1.bf16.msra.mxu1 %v754_v45  ;;  %v52_v1 = vld [vmem:[#allocation2 + $0xd0] sm:$0xff]  ;;  %v163_v3 = vld [vmem:[#allocation2 + $0x198] sm:$0xff]  ;;  %v55_v4 = vld [vmem:[#allocation2 + $0xe8] sm:$0xff]  ;;  %v762_v6 = vpack.c.bf16 %v158_v62, %v156_v61 }
  0x22   :  { %731 = vmatpush1.bf16.msra.mxu0 %v730_v31  ;;  %757 = vmatprep.subr.bf16.mxu1 %v756_v48  ;;  %v57_v5 = vld [vmem:[#allocation2 + $0xf8] sm:$0xff]  ;;  %v742_v7 = vpack.c.bf16 %v52_v1, %v50_v59  ;;  %v54_v8 = vld [vmem:[#allocation2 + $0xe0] sm:$0xff]  ;;  %v764_v9 = vpack.c.bf16 %v163_v3, %v161_v2  ;;  %v162_v11 = vld [vmem:[#allocation2 + $0x190] sm:$0xff] }
  0x23   :  { %733 = vmatprep.subr.bf16.mxu0 %v732_v36  ;;  %v160_v10 = vld [vmem:[#allocation2 + $0x180] sm:$0xff]  ;;  %v744_v12 = vpack.c.bf16 %v57_v5, %v55_v4  ;;  %v56_v13 = vld [vmem:[#allocation2 + $0xf0] sm:$0xff]  ;;  %v165_v14 = vld [vmem:[#allocation2 + $0x1a8] sm:$0xff] }
  0x24   :  { %v167_v15 = vld [vmem:[#allocation2 + $0x1b8] sm:$0xff]  ;;  %v766_v16 = vpack.c.bf16 %v162_v11, %v160_v10  ;;  %v746_v17 = vpack.c.bf16 %v56_v13, %v54_v8  ;;  %v164_v19 = vld [vmem:[#allocation2 + $0x1a0] sm:$0xff]  ;;  %v166_v20 = vld [vmem:[#allocation2 + $0x1b0] sm:$0xff] }
  0x25   :  { %759 = vmatpush1.bf16.msra.mxu1 %v758_v57  ;;  %v768_v18 = vpack.c.bf16 %v167_v15, %v165_v14  ;;  %v169_v21 = vld [vmem:[#allocation2 + $0x1c8] sm:$0xff]  ;;  %v171_v22 = vld [vmem:[#allocation2 + $0x1d8] sm:$0xff]  ;;  %v770_v23 = vpack.c.bf16 %v166_v20, %v164_v19  ;;  %v25_v24 = vld [vmem:[%s1028_s0] sm:$0xff] }
  0x26   :  { %735 = vmatpush1.bf16.msra.mxu0 %v734_v46  ;;  %761 = vmatprep.subr.bf16.mxu1 %v760_v60  ;;  %v772_v25 = vpack.c.bf16 %v171_v22, %v169_v21  ;;  %v168_v26 = vld [vmem:[#allocation2 + $0x1c0] sm:$0xff]  ;;  %v170_v27 = vld [vmem:[#allocation2 + $0x1d0] sm:$0xff]  ;;  %v173_v28 = vld [vmem:[#allocation2 + $0x1e8] sm:$0xff] }
  0x27   :  { %737 = vmatprep.subr.bf16.mxu0 %v736_v51  ;;  %v175_v29 = vld [vmem:[#allocation2 + $0x1f8] sm:$0xff]  ;;  %v774_v30 = vpack.c.bf16 %v170_v27, %v168_v26  ;;  %v172_v32 = vld [vmem:[#allocation2 + $0x1e0] sm:$0xff]  ;;  %v174_v33 = vld [vmem:[#allocation2 + $0x1f0] sm:$0xff] }
  0x28   :  { %v776_v31 = vpack.c.bf16 %v175_v29, %v173_v28  ;;  %v177_v34 = vld [vmem:[#allocation2 + $0x208] sm:$0xff]  ;;  %v179_v35 = vld [vmem:[#allocation2 + $0x218] sm:$0xff]  ;;  %v778_v36 = vpack.c.bf16 %v174_v33, %v172_v32  ;;  %v176_v38 = vld [vmem:[#allocation2 + $0x200] sm:$0xff] }
  0x29   :  { %763 = vmatpush1.bf16.msra.mxu1 %v762_v6  ;;  %v780_v37 = vpack.c.bf16 %v179_v35, %v177_v34  ;;  %v178_v39 = vld [vmem:[#allocation2 + $0x210] sm:$0xff]  ;;  %v181_v40 = vld [vmem:[#allocation2 + $0x228] sm:$0xff]  ;;  %v183_v41 = vld [vmem:[#allocation2 + $0x238] sm:$0xff] }
  0x2a   :  { %739 = vmatpush1.bf16.msra.mxu0 %v738_v58  ;;  %765 = vmatprep.subr.bf16.mxu1 %v764_v9  ;;  %v782_v42 = vpack.c.bf16 %v178_v39, %v176_v38  ;;  %v784_v43 = vpack.c.bf16 %v183_v41, %v181_v40  ;;  %v180_v44 = vld [vmem:[#allocation2 + $0x220] sm:$0xff]  ;;  %v182_v45 = vld [vmem:[#allocation2 + $0x230] sm:$0xff]  ;;  %v185_v46 = vld [vmem:[#allocation2 + $0x248] sm:$0xff] }
  0x2b   :  { %741 = vmatprep.subr.bf16.mxu0 %v740_v63  ;;  %v187_v47 = vld [vmem:[#allocation2 + $0x258] sm:$0xff]  ;;  %v786_v48 = vpack.c.bf16 %v182_v45, %v180_v44  ;;  %v184_v50 = vld [vmem:[#allocation2 + $0x240] sm:$0xff]  ;;  %v186_v51 = vld [vmem:[#allocation2 + $0x250] sm:$0xff] }
  0x2c   :  { %v788_v49 = vpack.c.bf16 %v187_v47, %v185_v46  ;;  %v189_v52 = vld [vmem:[#allocation2 + $0x268] sm:$0xff]  ;;  %v191_v53 = vld [vmem:[#allocation2 + $0x278] sm:$0xff]  ;;  %v790_v54 = vpack.c.bf16 %v186_v51, %v184_v50  ;;  %v188_v56 = vld [vmem:[#allocation2 + $0x260] sm:$0xff] }
  0x2d   :  { %767 = vmatpush1.bf16.msra.mxu1 %v766_v16  ;;  %v792_v55 = vpack.c.bf16 %v191_v53, %v189_v52  ;;  %v190_v57 = vld [vmem:[#allocation2 + $0x270] sm:$0xff]  ;;  %v193_v58 = vld [vmem:[#allocation2 + $0x288] sm:$0xff]  ;;  %v195_v59 = vld [vmem:[#allocation2 + $0x298] sm:$0xff] }
  0x2e   :  { %743 = vmatpush1.bf16.msra.mxu0 %v742_v7  ;;  %769 = vmatprep.subr.bf16.mxu1 %v768_v18  ;;  %v794_v60 = vpack.c.bf16 %v190_v57, %v188_v56  ;;  %v796_v61 = vpack.c.bf16 %v195_v59, %v193_v58  ;;  %v192_v62 = vld [vmem:[#allocation2 + $0x280] sm:$0xff]  ;;  %v194_v63 = vld [vmem:[#allocation2 + $0x290] sm:$0xff]  ;;  %v197_v1 = vld [vmem:[#allocation2 + $0x2a8] sm:$0xff] }
  0x2f   :  { %745 = vmatprep.subr.bf16.mxu0 %v744_v12  ;;  %v199_v2 = vld [vmem:[#allocation2 + $0x2b8] sm:$0xff]  ;;  %v798_v3 = vpack.c.bf16 %v194_v63, %v192_v62  ;;  %v196_v5 = vld [vmem:[#allocation2 + $0x2a0] sm:$0xff]  ;;  %v198_v6 = vld [vmem:[#allocation2 + $0x2b0] sm:$0xff] }
  0x30   :  { %v800_v4 = vpack.c.bf16 %v199_v2, %v197_v1  ;;  %v201_v7 = vld [vmem:[#allocation2 + $0x2c8] sm:$0xff]  ;;  %v203_v8 = vld [vmem:[#allocation2 + $0x2d8] sm:$0xff]  ;;  %v802_v9 = vpack.c.bf16 %v198_v6, %v196_v5  ;;  %v200_v11 = vld [vmem:[#allocation2 + $0x2c0] sm:$0xff] }
  0x31   :  { %771 = vmatpush1.bf16.msra.mxu1 %v770_v23  ;;  %v804_v10 = vpack.c.bf16 %v203_v8, %v201_v7  ;;  %v202_v12 = vld [vmem:[#allocation2 + $0x2d0] sm:$0xff]  ;;  %v205_v14 = vld [vmem:[#allocation2 + $0x2e8] sm:$0xff]  ;;  %v207_v15 = vld [vmem:[#allocation2 + $0x2f8] sm:$0xff] }
  0x32   :  { %747 = vmatpush1.bf16.msra.mxu0 %v746_v17  ;;  %773 = vmatprep.subr.bf16.mxu1 %v772_v25  ;;  %v806_v13 = vpack.c.bf16 %v202_v12, %v200_v11  ;;  %v808_v16 = vpack.c.bf16 %v207_v15, %v205_v14  ;;  %v204_v17 = vld [vmem:[#allocation2 + $0x2e0] sm:$0xff]  ;;  %v206_v18 = vld [vmem:[#allocation2 + $0x2f0] sm:$0xff]  ;;  %v295_v20 = vld [vmem:[#allocation2 + $0x308] sm:$0xff] }
  0x33   :  { %v810_v19 = vpack.c.bf16 %v206_v18, %v204_v17  ;;  %v297_v21 = vld [vmem:[#allocation2 + $0x318] sm:$0xff]  ;;  %v294_v22 = vld [vmem:[#allocation2 + $0x300] sm:$0xff]  ;;  %v299_v25 = vld [vmem:[#allocation2 + $0x328] sm:$0xff] }
  0x34   :  { %v812_v23 = vpack.c.bf16 %v297_v21, %v295_v20  ;;  %v301_v26 = vld [vmem:[#allocation2 + $0x338] sm:$0xff]  ;;  %v298_v29 = vld [vmem:[#allocation2 + $0x320] sm:$0xff]  ;;  %v332_v15 = vld [vmem:[#allocation2 + $0x430] sm:$0xff] }
  0x35   :  { %136 = vmatmul.mubr.f32.vlgmr.msra.gmra.mrb[0].mxu0 %v25_v24  ;;  %775 = vmatpush1.bf16.msra.mxu1 %v774_v30  ;;  %v296_v24 = vld [vmem:[#allocation2 + $0x310] sm:$0xff]  ;;  %v816_v28 = vpack.c.bf16 %v301_v26, %v299_v25  ;;  %v305_v32 = vld [vmem:[#allocation2 + $0x358] sm:$0xff]  ;;  %v302_v35 = vld [vmem:[#allocation2 + $0x340] sm:$0xff] }
  0x36   :  { %777 = vmatprep.subr.bf16.mxu1 %v776_v31  ;;  %v814_v27 = vpack.c.bf16 %v296_v24, %v294_v22  ;;  %v300_v30 = vld [vmem:[#allocation2 + $0x330] sm:$0xff]  ;;  %v303_v31 = vld [vmem:[#allocation2 + $0x348] sm:$0xff]  ;;  %813 = vmatprep.subr.bf16.mxu0 %v812_v23  ;;  %v309_v38 = vld [vmem:[#allocation2 + $0x378] sm:$0xff] }
  0x37   :  { %v818_v33 = vpack.c.bf16 %v300_v30, %v298_v29  ;;  %v820_v34 = vpack.c.bf16 %v305_v32, %v303_v31  ;;  %v306_v41 = vld [vmem:[#allocation2 + $0x360] sm:$0xff]  ;;  %v313_v44 = vld [vmem:[#allocation2 + $0x398] sm:$0xff]  ;;  %v336_v21 = vld [vmem:[#allocation2 + $0x450] sm:$0xff] }
  0x38   :  { %815 = vmatpush1.bf16.msra.mxu0 %v814_v27  ;;  %v310_v47 = vld [vmem:[#allocation2 + $0x380] sm:$0xff]  ;;  %v317_v50 = vld [vmem:[#allocation2 + $0x3b8] sm:$0xff]  ;;  %v339_v22 = vld [vmem:[#allocation2 + $0x468] sm:$0xff] }
  0x39   :  { %779 = vmatpush1.bf16.msra.mxu1 %v778_v36  ;;  %817 = vmatprep.subr.bf16.mxu0 %v816_v28  ;;  %v304_v36 = vld [vmem:[#allocation2 + $0x350] sm:$0xff]  ;;  %v314_v53 = vld [vmem:[#allocation2 + $0x3a0] sm:$0xff]  ;;  %v321_v56 = vld [vmem:[#allocation2 + $0x3d8] sm:$0xff] }
  0x3a   :  { %781 = vmatprep.subr.bf16.mxu1 %v780_v37  ;;  %v307_v37 = vld [vmem:[#allocation2 + $0x368] sm:$0xff]  ;;  %v822_v39 = vpack.c.bf16 %v304_v36, %v302_v35  ;;  %v318_v59 = vld [vmem:[#allocation2 + $0x3c0] sm:$0xff]  ;;  %v325_v62 = vld [vmem:[#allocation2 + $0x3f8] sm:$0xff] }
  0x3b   :  { %v824_v40 = vpack.c.bf16 %v309_v38, %v307_v37  ;;  %v322_v2 = vld [vmem:[#allocation2 + $0x3e0] sm:$0xff]  ;;  %v329_v5 = vld [vmem:[#allocation2 + $0x418] sm:$0xff]  ;;  %v340_v27 = vld [vmem:[#allocation2 + $0x470] sm:$0xff] }
  0x3c   :  { %819 = vmatpush1.bf16.msra.mxu0 %v818_v33  ;;  %v326_v8 = vld [vmem:[#allocation2 + $0x400] sm:$0xff]  ;;  %v333_v11 = vld [vmem:[#allocation2 + $0x438] sm:$0xff]  ;;  %v343_v28 = vld [vmem:[#allocation2 + $0x488] sm:$0xff] }
  0x3d   :  { %783 = vmatpush1.bf16.msra.mxu1 %v782_v42  ;;  %821 = vmatprep.subr.bf16.mxu0 %v820_v34  ;;  %v308_v42 = vld [vmem:[#allocation2 + $0x370] sm:$0xff]  ;;  %v330_v14 = vld [vmem:[#allocation2 + $0x420] sm:$0xff]  ;;  %v337_v17 = vld [vmem:[#allocation2 + $0x458] sm:$0xff] }
  0x3e   :  { %785 = vmatprep.subr.bf16.mxu1 %v784_v43  ;;  %v311_v43 = vld [vmem:[#allocation2 + $0x388] sm:$0xff]  ;;  %v826_v45 = vpack.c.bf16 %v308_v42, %v306_v41  ;;  %v850_v18 = vpack.c.bf16 %v332_v15, %v330_v14  ;;  %v334_v20 = vld [vmem:[#allocation2 + $0x440] sm:$0xff]  ;;  %v341_v23 = vld [vmem:[#allocation2 + $0x478] sm:$0xff] }
  0x3f   :  { %v828_v46 = vpack.c.bf16 %v313_v44, %v311_v43  ;;  %v854_v24 = vpack.c.bf16 %v336_v21, %v334_v20  ;;  %v856_v25 = vpack.c.bf16 %v341_v23, %v339_v22  ;;  %v338_v26 = vld [vmem:[#allocation2 + $0x460] sm:$0xff]  ;;  %v345_v29 = vld [vmem:[#allocation2 + $0x498] sm:$0xff]  ;;  %v344_v33 = vld [vmem:[#allocation2 + $0x490] sm:$0xff]  ;;  %v61_v44 = vlaneseq }
  0x40   :  { %823 = vmatpush1.bf16.msra.mxu0 %v822_v39  ;;  %v858_v30 = vpack.c.bf16 %v340_v27, %v338_v26  ;;  %v860_v31 = vpack.c.bf16 %v345_v29, %v343_v28  ;;  %v342_v32 = vld [vmem:[#allocation2 + $0x480] sm:$0xff]  ;;  %v347_v34 = vld [vmem:[#allocation2 + $0x4a8] sm:$0xff]  ;;  %v349_v35 = vld [vmem:[#allocation2 + $0x4b8] sm:$0xff] }
  0x41   :  { %787 = vmatpush1.bf16.msra.mxu1 %v786_v48  ;;  %825 = vmatprep.subr.bf16.mxu0 %v824_v40  ;;  %v312_v48 = vld [vmem:[#allocation2 + $0x390] sm:$0xff]  ;;  %v862_v36 = vpack.c.bf16 %v344_v33, %v342_v32  ;;  %v864_v37 = vpack.c.bf16 %v349_v35, %v347_v34  ;;  %v346_v38 = vld [vmem:[#allocation2 + $0x4a0] sm:$0xff]  ;;  %v351_v40 = vld [vmem:[#allocation2 + $0x4c8] sm:$0xff] }
  0x42   :  { %789 = vmatprep.subr.bf16.mxu1 %v788_v49  ;;  %v315_v49 = vld [vmem:[#allocation2 + $0x3a8] sm:$0xff]  ;;  %v830_v51 = vpack.c.bf16 %v312_v48, %v310_v47  ;;  %v348_v39 = vld [vmem:[#allocation2 + $0x4b0] sm:$0xff]  ;;  %v353_v41 = vld [vmem:[#allocation2 + $0x4d8] sm:$0xff] }
  0x43   :  { %v832_v52 = vpack.c.bf16 %v317_v50, %v315_v49  ;;  %v866_v42 = vpack.c.bf16 %v348_v39, %v346_v38  ;;  %v868_v43 = vpack.c.bf16 %v353_v41, %v351_v40  ;;  %v59_v47 = vld [vmem:[#allocation2 + $0x800] ss:$8 sm:$0x3]  ;;  %v454_v14 = vld [vmem:[#allocation2 + $0x558] sm:$0xff] }
  0x44   :  { %827 = vmatpush1.bf16.msra.mxu0 %v826_v45  ;;  %v62_v45 = vshrl.u32 %v61_v44, 7  ;;  %v458_v20 = vld [vmem:[#allocation2 + $0x578] sm:$0xff]  ;;  %v455_v23 = vld [vmem:[#allocation2 + $0x560] sm:$0xff] }
  0x45   :  { %791 = vmatpush1.bf16.msra.mxu1 %v790_v54  ;;  %829 = vmatprep.subr.bf16.mxu0 %v828_v46  ;;  %v316_v54 = vld [vmem:[#allocation2 + $0x3b0] sm:$0xff]  ;;  %v462_v26 = vld [vmem:[#allocation2 + $0x598] sm:$0xff]  ;;  %v459_v29 = vld [vmem:[#allocation2 + $0x580] sm:$0xff] }
  0x46   :  { %793 = vmatprep.subr.bf16.mxu1 %v792_v55  ;;  %v319_v55 = vld [vmem:[#allocation2 + $0x3c8] sm:$0xff]  ;;  %v834_v57 = vpack.c.bf16 %v316_v54, %v314_v53  ;;  %v1008_v46 = vsub.s32 0, %v62_v45  ;;  %v1010_v48 = vsub.s32 1, %v62_v45  ;;  %v466_v32 = vld [vmem:[#allocation2 + $0x5b8] sm:$0xff]  ;;  %v463_v35 = vld [vmem:[#allocation2 + $0x5a0] sm:$0xff] }
  0x47   :  { %v836_v58 = vpack.c.bf16 %v321_v56, %v319_v55  ;;  %v470_v38 = vld [vmem:[#allocation2 + $0x5d8] sm:$0xff]  ;;  %v467_v41 = vld [vmem:[#allocation2 + $0x5c0] sm:$0xff] }
  0x48   :  { %831 = vmatpush1.bf16.msra.mxu0 %v830_v51  ;;  %v64_v49 = vrot.slane %v59_v47, %v1008_v46  ;;  %v68_v50 = vrot.slane %v59_v47, %v1010_v48  ;;  %v209_v45 = vld [vmem:[#allocation2 + $0x801] ss:$8 sm:$0x3] }
  0x49   :  { %795 = vmatpush1.bf16.msra.mxu1 %v794_v60  ;;  %833 = vmatprep.subr.bf16.mxu0 %v832_v52  ;;  %v320_v60 = vld [vmem:[#allocation2 + $0x3d0] sm:$0xff]  ;;  %v214_v47 = vrot.slane %v209_v45, %v1008_v46 }
  0x4a   :  { %797 = vmatprep.subr.bf16.mxu1 %v796_v61  ;;  %v323_v61 = vld [vmem:[#allocation2 + $0x3e8] sm:$0xff]  ;;  %v838_v63 = vpack.c.bf16 %v320_v60, %v318_v59 }
  0x4b   :  { %v840_v1 = vpack.c.bf16 %v325_v62, %v323_v61  ;;  %v355_v60 = vld [vmem:[#allocation2 + $0x4e8] sm:$0xff]  ;;  %v357_v61 = vld [vmem:[#allocation2 + $0x4f8] sm:$0xff] }
  0x4c   :  { %835 = vmatpush1.bf16.msra.mxu0 %v834_v57  ;;  %v350_v57 = vld [vmem:[#allocation2 + $0x4c0] sm:$0xff]  ;;  %v872_v62 = vpack.c.bf16 %v357_v61, %v355_v60  ;;  %v473_v60 = vld [vmem:[#allocation2 + $0x5f0] sm:$0xff] }
  0x4d   :  { %799 = vmatpush1.bf16.msra.mxu1 %v798_v3  ;;  %837 = vmatprep.subr.bf16.mxu0 %v836_v58  ;;  %v324_v3 = vld [vmem:[#allocation2 + $0x3f0] sm:$0xff] }
  0x4e   :  { %801 = vmatprep.subr.bf16.mxu1 %v800_v4  ;;  %v327_v4 = vld [vmem:[#allocation2 + $0x408] sm:$0xff]  ;;  %v842_v6 = vpack.c.bf16 %v324_v3, %v322_v2  ;;  %v352_v58 = vld [vmem:[#allocation2 + $0x4d0] sm:$0xff] }
  0x4f   :  { %v844_v7 = vpack.c.bf16 %v329_v5, %v327_v4  ;;  %v870_v59 = vpack.c.bf16 %v352_v58, %v350_v57  ;;  %v444_v3 = vld [vmem:[#allocation2 + $0x508] sm:$0xff]  ;;  %v446_v4 = vld [vmem:[#allocation2 + $0x518] sm:$0xff]  ;;  %v443_v5 = vld [vmem:[#allocation2 + $0x500] sm:$0xff] }
  0x50   :  { %839 = vmatpush1.bf16.msra.mxu0 %v838_v63  ;;  %v354_v63 = vld [vmem:[#allocation2 + $0x4e0] sm:$0xff]  ;;  %v474_v57 = vld [vmem:[#allocation2 + $0x5f8] sm:$0xff] }
  0x51   :  { %803 = vmatpush1.bf16.msra.mxu1 %v802_v9  ;;  %841 = vmatprep.subr.bf16.mxu0 %v840_v1  ;;  %v328_v9 = vld [vmem:[#allocation2 + $0x410] sm:$0xff] }
  0x52   :  { %805 = vmatprep.subr.bf16.mxu1 %v804_v10  ;;  %v331_v10 = vld [vmem:[#allocation2 + $0x428] sm:$0xff]  ;;  %v846_v12 = vpack.c.bf16 %v328_v9, %v326_v8  ;;  %v356_v1 = vld [vmem:[#allocation2 + $0x4f0] sm:$0xff]  ;;  %v450_v9 = vld [vmem:[#allocation2 + $0x538] sm:$0xff] }
  0x53   :  { %v874_v2 = vpack.c.bf16 %v356_v1, %v354_v63  ;;  %v448_v8 = vld [vmem:[#allocation2 + $0x528] sm:$0xff]  ;;  %v578_v63 = vld [vmem:[#allocation2 + $0x710] sm:$0xff]  ;;  %v561_v1 = vld [vmem:[#allocation2 + $0x600] sm:$0xff] }
  0x54   :  { %843 = vmatpush1.bf16.msra.mxu0 %v842_v6  ;;  %v876_v6 = vpack.c.bf16 %v446_v4, %v444_v3  ;;  %v562_v3 = vld [vmem:[#allocation2 + $0x610] sm:$0xff]  ;;  %v579_v4 = vld [vmem:[#allocation2 + $0x720] sm:$0xff] }
  0x55   :  { %807 = vmatpush1.bf16.msra.mxu1 %v806_v13  ;;  %845 = vmatprep.subr.bf16.mxu0 %v844_v7  ;;  %v848_v13 = vpack.c.bf16 %v333_v11, %v331_v10  ;;  %v445_v7 = vld [vmem:[#allocation2 + $0x510] sm:$0xff]  ;;  %v880_v10 = vpack.c.bf16 %v450_v9, %v448_v8  ;;  %v447_v11 = vld [vmem:[#allocation2 + $0x520] sm:$0xff] }
  0x56   :  { %809 = vmatprep.subr.bf16.mxu1 %v808_v16  ;;  %v335_v16 = vld [vmem:[#allocation2 + $0x448] sm:$0xff]  ;;  %v563_v8 = vld [vmem:[#allocation2 + $0x620] sm:$0xff]  ;;  %v564_v9 = vld [vmem:[#allocation2 + $0x630] sm:$0xff] }
  0x58   :  { %847 = vmatpush1.bf16.msra.mxu0 %v846_v12  ;;  %v449_v12 = vld [vmem:[#allocation2 + $0x530] sm:$0xff] }
  0x59   :  { %811 = vmatpush1.bf16.msra.mxu1 %v810_v19  ;;  %849 = vmatprep.subr.bf16.mxu0 %v848_v13  ;;  %v852_v19 = vpack.c.bf16 %v337_v17, %v335_v16  ;;  %v452_v13 = vld [vmem:[#allocation2 + $0x548] sm:$0xff]  ;;  %v882_v15 = vpack.c.bf16 %v449_v12, %v447_v11  ;;  %v451_v17 = vld [vmem:[#allocation2 + $0x540] sm:$0xff]  ;;  %v914_v11 = vpack.c.bf16 %v564_v9, %v563_v8 }
  0x5a   :  { %877 = vmatprep.subr.bf16.mxu1 %v876_v6  ;;  %v884_v16 = vpack.c.bf16 %v454_v14, %v452_v13  ;;  %v910_v6 = vpack.c.bf16 %v562_v3, %v561_v1  ;;  %v565_v13 = vld [vmem:[#allocation2 + $0x640] sm:$0xff]  ;;  %v566_v14 = vld [vmem:[#allocation2 + $0x650] sm:$0xff] }
  0x5b   :  { %v593_v3 = vld [vmem:[#allocation2 + $0x804] ss:$0 sm:$0xff] }
  0x5c   :  { %851 = vmatpush1.bf16.msra.mxu0 %v850_v18  ;;  %v453_v18 = vld [vmem:[#allocation2 + $0x550] sm:$0xff] }
  0x5d   :  { %853 = vmatprep.subr.bf16.mxu0 %v852_v19  ;;  %v456_v19 = vld [vmem:[#allocation2 + $0x568] sm:$0xff]  ;;  %v886_v21 = vpack.c.bf16 %v453_v18, %v451_v17  ;;  %v918_v17 = vpack.c.bf16 %v566_v14, %v565_v13 }
  0x5e   :  { %v888_v22 = vpack.c.bf16 %v458_v20, %v456_v19  ;;  %v567_v19 = vld [vmem:[#allocation2 + $0x660] sm:$0xff]  ;;  %v568_v20 = vld [vmem:[#allocation2 + $0x670] sm:$0xff] }
  0x60   :  { %855 = vmatpush1.bf16.msra.mxu0 %v854_v24  ;;  %v457_v24 = vld [vmem:[#allocation2 + $0x570] sm:$0xff] }
  0x61   :  { %857 = vmatprep.subr.bf16.mxu0 %v856_v25  ;;  %v460_v25 = vld [vmem:[#allocation2 + $0x588] sm:$0xff]  ;;  %v890_v27 = vpack.c.bf16 %v457_v24, %v455_v23  ;;  %v922_v23 = vpack.c.bf16 %v568_v20, %v567_v19 }
  0x62   :  { %v892_v28 = vpack.c.bf16 %v462_v26, %v460_v25  ;;  %v569_v25 = vld [vmem:[#allocation2 + $0x680] sm:$0xff]  ;;  %v570_v26 = vld [vmem:[#allocation2 + $0x690] sm:$0xff] }
  0x64   :  { %859 = vmatpush1.bf16.msra.mxu0 %v858_v30  ;;  %v461_v30 = vld [vmem:[#allocation2 + $0x590] sm:$0xff] }
  0x65   :  { %861 = vmatprep.subr.bf16.mxu0 %v860_v31  ;;  %v464_v31 = vld [vmem:[#allocation2 + $0x5a8] sm:$0xff]  ;;  %v894_v33 = vpack.c.bf16 %v461_v30, %v459_v29  ;;  %v926_v29 = vpack.c.bf16 %v570_v26, %v569_v25 }
  0x66   :  { %v896_v34 = vpack.c.bf16 %v466_v32, %v464_v31  ;;  %v571_v31 = vld [vmem:[#allocation2 + $0x6a0] sm:$0xff]  ;;  %v572_v32 = vld [vmem:[#allocation2 + $0x6b0] sm:$0xff] }
  0x68   :  { %863 = vmatpush1.bf16.msra.mxu0 %v862_v36  ;;  %v465_v36 = vld [vmem:[#allocation2 + $0x5b0] sm:$0xff] }
  0x69   :  { %865 = vmatprep.subr.bf16.mxu0 %v864_v37  ;;  %v468_v37 = vld [vmem:[#allocation2 + $0x5c8] sm:$0xff]  ;;  %v898_v39 = vpack.c.bf16 %v465_v36, %v463_v35  ;;  %v930_v35 = vpack.c.bf16 %v572_v32, %v571_v31 }
  0x6a   :  { %v900_v40 = vpack.c.bf16 %v470_v38, %v468_v37  ;;  %v359_v37 = vld [vmem:[#allocation2 + $0x802] ss:$8 sm:$0x3] }
  0x6b   :  { %v364_v38 = vrot.slane %v359_v37, %v1008_v46 }
  0x6c   :  { %867 = vmatpush1.bf16.msra.mxu0 %v866_v42  ;;  %v469_v42 = vld [vmem:[#allocation2 + $0x5d0] sm:$0xff] }
  0x6d   :  { %869 = vmatprep.subr.bf16.mxu0 %v868_v43  ;;  %v902_v43 = vpack.c.bf16 %v469_v42, %v467_v41 }
  0x70   :  { %871 = vmatpush1.bf16.msra.mxu0 %v870_v59  ;;  %v471_v59 = vld [vmem:[#allocation2 + $0x5e0] sm:$0xff] }
  0x71   :  { %873 = vmatprep.subr.bf16.mxu0 %v872_v62  ;;  %v906_v61 = vpack.c.bf16 %v473_v60, %v471_v59  ;;  %v577_v62 = vld [vmem:[#allocation2 + $0x700] sm:$0xff] }
  0x74   :  { %875 = vmatpush1.bf16.msra.mxu0 %v874_v2  ;;  %v908_v2 = vpack.c.bf16 %v578_v63, %v577_v62 }
  0x76   :  { %909 = vmatprep.subr.bf16.mxu0 %v908_v2 }
 0x108   :  { %v137_v51 = vpop.f32.mrb[0].mxu0 }
 0x109   :  { %v138_v52 = vadd.f32 %v137_v51, %v64_v49  ;;  %v139_v53 = vpop.f32.mrb[1].mxu0  ;;  %v218_v49 = vrot.slane %v209_v45, %v1010_v48  ;;  %v573_v45 = vld [vmem:[#allocation2 + $0x6c0] sm:$0xff] }
 0x10a   :  { %v140_v54 = vadd.f32 %v139_v53, %v68_v50 }
 0x10b   :  { %v142_v56 = vmax.f32 %v138_v52, 0.0 }
 0x10c   :  { %v143_v55 = vmax.f32 %v140_v54, 0.0 }
 0x10e   :  { %285 = vmatprep.mubr.f32.mxu1 %v143_v55 }
 0x10f   :  { %286 = vmatmul.mubr.f32.vlgmr.msra.gmra.mrb[0].mxu1 %v142_v56  ;;  %v472_v56 = vld [vmem:[#allocation2 + $0x5e8] sm:$0xff] }
 0x110   :  { %552 = vmatprep.mubr.f32.mxu1 %v975_v0  ;;  %v878_v0 = vpack.c.bf16 %v445_v7, %v443_v5  ;;  %v904_v58 = vpack.c.bf16 %v474_v57, %v472_v56  ;;  %v580_v5 = vld [vmem:[#allocation2 + $0x730] sm:$0xff]  ;;  %v476_v56 = vld [vmem:[#allocation2 + $0x803] ss:$8 sm:$0x3] }
 0x111   :  { %v912_v7 = vpack.c.bf16 %v580_v5, %v579_v4  ;;  %v481_v57 = vrot.slane %v476_v56, %v1008_v46  ;;  %v665_v46 = vand.u32 127, %v61_v44 }
 0x112   :  { %879 = vmatpush1.bf16.msra.mxu1 %v878_v0  ;;  %v581_v0 = vld [vmem:[#allocation2 + $0x740] sm:$0xff] }
 0x113   :  { %881 = vmatprep.subr.bf16.mxu1 %v880_v10  ;;  %v582_v10 = vld [vmem:[#allocation2 + $0x750] sm:$0xff]  ;;  %vm666_vm0 = vcmp.eq.s32.totalorder %v665_v46, 1 }
 0x114   :  { %v916_v12 = vpack.c.bf16 %v582_v10, %v581_v0 }
 0x116   :  { %883 = vmatpush1.bf16.msra.mxu1 %v882_v15  ;;  %v583_v15 = vld [vmem:[#allocation2 + $0x760] sm:$0xff] }
 0x117   :  { %885 = vmatprep.subr.bf16.mxu1 %v884_v16  ;;  %v584_v16 = vld [vmem:[#allocation2 + $0x770] sm:$0xff] }
 0x118   :  { %v920_v18 = vpack.c.bf16 %v584_v16, %v583_v15 }
 0x11a   :  { %887 = vmatpush1.bf16.msra.mxu1 %v886_v21  ;;  %v585_v21 = vld [vmem:[#allocation2 + $0x780] sm:$0xff] }
 0x11b   :  { %889 = vmatprep.subr.bf16.mxu1 %v888_v22  ;;  %v586_v22 = vld [vmem:[#allocation2 + $0x790] sm:$0xff] }
 0x11c   :  { %v924_v24 = vpack.c.bf16 %v586_v22, %v585_v21 }
 0x11e   :  { %891 = vmatpush1.bf16.msra.mxu1 %v890_v27  ;;  %v587_v27 = vld [vmem:[#allocation2 + $0x7a0] sm:$0xff] }
 0x11f   :  { %893 = vmatprep.subr.bf16.mxu1 %v892_v28  ;;  %v588_v28 = vld [vmem:[#allocation2 + $0x7b0] sm:$0xff] }
 0x120   :  { %v928_v30 = vpack.c.bf16 %v588_v28, %v587_v27 }
 0x122   :  { %895 = vmatpush1.bf16.msra.mxu1 %v894_v33  ;;  %v589_v33 = vld [vmem:[#allocation2 + $0x7c0] sm:$0xff] }
 0x123   :  { %897 = vmatprep.subr.bf16.mxu1 %v896_v34  ;;  %v590_v34 = vld [vmem:[#allocation2 + $0x7d0] sm:$0xff] }
 0x124   :  { %v932_v36 = vpack.c.bf16 %v590_v34, %v589_v33 }
 0x126   :  { %899 = vmatpush1.bf16.msra.mxu1 %v898_v39  ;;  %v368_v39 = vrot.slane %v359_v37, %v1010_v48 }
 0x127   :  { %901 = vmatprep.subr.bf16.mxu1 %v900_v40 }
 0x12a   :  { %903 = vmatpush1.bf16.msra.mxu1 %v902_v43 }
 0x12b   :  { %905 = vmatprep.subr.bf16.mxu1 %v904_v58  ;;  %v485_v58 = vrot.slane %v476_v56, %v1010_v48 }
 0x12e   :  { %907 = vmatpush1.bf16.msra.mxu1 %v906_v61 }
 0x1e2   :  { %v287_v50 = vpop.f32.mrb[0].mxu1 }
 0x1e3   :  { %v288_v51 = vadd.f32 %v287_v50, %v214_v47  ;;  %v289_v52 = vpop.f32.mrb[1].mxu1  ;;  %v574_v47 = vld [vmem:[#allocation2 + $0x6d0] sm:$0xff]  ;;  %v591_v50 = vld [vmem:[#allocation2 + $0x7e0] sm:$0xff] }
 0x1e4   :  { %v290_v53 = vadd.f32 %v289_v52, %v218_v49  ;;  %v934_v49 = vpack.c.bf16 %v574_v47, %v573_v45 }
 0x1e5   :  { %v292_v55 = vmax.f32 %v288_v51, 0.0  ;;  %v592_v51 = vld [vmem:[#allocation2 + $0x7f0] sm:$0xff] }
 0x1e6   :  { %v293_v54 = vmax.f32 %v290_v53, 0.0  ;;  %v936_v52 = vpack.c.bf16 %v592_v51, %v591_v50  ;;  %v575_v53 = vld [vmem:[#allocation2 + $0x6e0] sm:$0xff] }
 0x1e8   :  { %435 = vmatprep.mubr.f32.mxu0 %v293_v54  ;;  %v576_v54 = vld [vmem:[#allocation2 + $0x6f0] sm:$0xff] }
 0x1e9   :  { %436 = vmatmul.mubr.f32.vlgmr.msra.gmra.mrb[2].mxu0 %v292_v55  ;;  %v938_v55 = vpack.c.bf16 %v576_v54, %v575_v53 }
 0x1ea   :  { %911 = vmatpush3.bf16.msra.mxu0 %v910_v6 }
 0x1eb   :  { %913 = vmatprep.subr.bf16.mxu0 %v912_v7 }
 0x1ee   :  { %915 = vmatpush3.bf16.msra.mxu0 %v914_v11 }
 0x1ef   :  { %917 = vmatprep.subr.bf16.mxu0 %v916_v12 }
 0x1f2   :  { %919 = vmatpush3.bf16.msra.mxu0 %v918_v17 }
 0x1f3   :  { %921 = vmatprep.subr.bf16.mxu0 %v920_v18 }
 0x1f6   :  { %923 = vmatpush3.bf16.msra.mxu0 %v922_v23 }
 0x1f7   :  { %925 = vmatprep.subr.bf16.mxu0 %v924_v24 }
 0x1fa   :  { %927 = vmatpush3.bf16.msra.mxu0 %v926_v29 }
 0x1fb   :  { %929 = vmatprep.subr.bf16.mxu0 %v928_v30 }
 0x1fe   :  { %931 = vmatpush3.bf16.msra.mxu0 %v930_v35 }
 0x1ff   :  { %933 = vmatprep.subr.bf16.mxu0 %v932_v36 }
 0x202   :  { %935 = vmatpush3.bf16.msra.mxu0 %v934_v49 }
 0x203   :  { %937 = vmatprep.subr.bf16.mxu0 %v936_v52 }
 0x206   :  { %939 = vmatpush3.bf16.msra.mxu0 %v938_v55 }
 0x2bc   :  { %v437_v40 = vpop.f32.mrb[2].mxu0 }
 0x2bd   :  { %v438_v41 = vadd.f32 %v437_v40, %v364_v38  ;;  %v439_v42 = vpop.f32.mrb[3].mxu0 }
 0x2be   :  { %v440_v43 = vadd.f32 %v439_v42, %v368_v39 }
 0x2bf   :  { %442 = vst [vmem:[%s1030_s2] sm:$0xff] %v438_v41 }
 0x2c0   :  { %553 = vmatmul.mubr.f32.vlgmr.msra.gmra.mrb[2].mxu1 %v440_v43 }
 0x393   :  { %v554_v59 = vpop.f32.mrb[2].mxu1 }
 0x394   :  { %v555_v60 = vadd.f32 %v554_v59, %v481_v57  ;;  %v556_v61 = vpop.f32.mrb[3].mxu1 }
 0x395   :  { %v557_v62 = vadd.f32 %v556_v61, %v485_v58 }
 0x396   :  { %v559_v1 = vmax.f32 %v555_v60, 0.0 }
 0x397   :  { %v560_v63 = vmax.f32 %v557_v62, 0.0 }
 0x399   :  { %658 = vmatprep.mubr.f32.mxu0 %v560_v63 }
 0x39a   :  { %659 = vmatmul.mubr.f32.vlgmr.msra.gmra.mrb[4].mxu0 %v559_v1 }
 0x46d   :  { %v713_v2 = vpop.f32.mrb[4].mxu0 }
 0x46e   :  { %v714_v4 = vpop.f32.mrb[5].mxu0 }
 0x46f   :  { %v715_v5 = vadd.f32 %v714_v4, %v713_v2 }
 0x471   :  { %v661_v6 = vadd.f32 %v715_v5, %v593_v3 }
 0x473   :  { %v680_v7 = vmul.f32 -1.442695, %v661_v6 }
 0x475   :  { %944 = vpow2.f32 %v680_v7 }
 0x47f   :  { %v945_v8 = vpop.eup %944 }
 0x480   :  { %v670_v9 = vadd.f32 1.0, %v945_v8 }
 0x482   :  { %946 = vrcp.f32 %v670_v9 }
 0x48c   :  { %v947_v48 = vpop.eup %946 }
 0x48d   :  { %v673_v0 = vsel %vm666_vm0, %v947_v48, %v661_v6 }
 0x48e   :  { %674 = vst [vmem:[%s1030_s2 + $0x8] sm:$0xff] %v673_v0 }
 0x48f   :  { %679 = vsyncpa [#allocation3], 1 }

</bundles_post_ra>
